<compile_context>
chip_gen: v7x
topology: tpu7x:2x2x1
jax: 0.10.0
libtpu: 0.0.40
codegen_flags: <defaults>
</compile_context>

<pallas_src>
import functools

import jax
import jax.numpy as jnp
from jax.experimental import pallas as pl
from jax.experimental.pallas import tpu as pltpu


def _cdiv(a, b):
    return -(-a // b)


def _round_up(a, b):
    return _cdiv(a, b) * b


def _round_down(a, b):
    return (a // b) * b


def _vmem_physical_bytes():
    """Physical VMEM per TensorCore; conservative fallback if query fails."""
    try:
        info = pltpu.get_tpu_info()
        for attr in ("vmem_capacity_bytes", "vmem_size_bytes", "vmem_bytes"):
            v = getattr(info, attr, None)
            if v:
                return int(v)
    except Exception:
        pass
    return 64 * 1024 * 1024  # v7x per-TC size; safe lower bound everywhere


def _gap_rows_kernel(x_ref, o_ref, *, inv_hw):
    # x_ref: (tile_rows, H*W) -> o_ref: (tile_rows, 1)
    x = x_ref[...].astype(jnp.float32)
    s = jnp.sum(x, axis=-1, keepdims=True)
    o_ref[...] = (s * jnp.float32(inv_hw)).astype(o_ref.dtype)


def _gap_split_kernel(x_ref, o_ref, acc_ref, *, inv_hw, hw, tile_hw):
    # x_ref: (tile_rows, tile_hw); grid axis 1 tiles H*W (reduction axis, last).
    j = pl.program_id(1)

    @pl.when(j == 0)
    def _init():
        acc_ref[...] = jnp.zeros_like(acc_ref)

    x = x_ref[...].astype(jnp.float32)
    # Mask the ragged H*W tail of the last block (boundary-block garbage).
    col = j * tile_hw + jax.lax.broadcasted_iota(jnp.int32, x.shape, 1)
    x = jnp.where(col < hw, x, 0.0)
    acc_ref[...] += jnp.sum(x, axis=-1, keepdims=True)

    @pl.when(j == pl.num_programs(1) - 1)
    def _finalize():
        o_ref[...] = (acc_ref[...] * jnp.float32(inv_hw)).astype(o_ref.dtype)


def global_avg_pool_2d(x, *, vmem_budget_bytes=None):
    """x: (N, C, H, W) -> (N, C, 1, 1), mean over H and W per (n, c)."""
    N, C, H, W = x.shape
    rows = N * C
    hw = H * W
    x2 = x.reshape(rows, hw)  # contiguous row-major view: free

    itemsize = jnp.dtype(x.dtype).itemsize
    acc_itemsize = max(itemsize, 4)      # in-kernel f32 cast sets the footprint
    sublane = max(8, 32 // itemsize)     # 8 f32 / 16 bf16 / 32 int8

    vmem_limit = (_vmem_physical_bytes() * 3) // 4
    vmem_limit = max(32 * 1024 * 1024, min(vmem_limit, 96 * 1024 * 1024))
    budget = (vmem_limit // 4) if vmem_budget_bytes is None else int(vmem_budget_bytes)

    inv_hw = 1.0 / float(hw)
    out_shape = jax.ShapeDtypeStruct((rows, 1), x.dtype)
    row_bytes = hw * acc_itemsize

    if sublane * row_bytes <= budget or hw <= 128:
        # ---- Path A: one block spans the full H*W extent of each row. ----
        max_rows = max(sublane, _round_down(budget // row_bytes, sublane))
        tile_rows = min(_round_up(rows, sublane), max_rows)
        # Prefer >= ~8 grid steps (megacore / pipelining) while blocks >= 1 MiB.
        per_step = _round_up(_cdiv(rows, 8), sublane)
        if per_step * row_bytes >= (1 << 20):
            tile_rows = min(tile_rows, per_step)
        if tile_rows >= rows:
            tile_rows = rows  # full-extent block: always legal, no boundary
        grid = (_cdiv(rows, tile_rows),)

        out2 = pl.pallas_call(
            functools.partial(_gap_rows_kernel, inv_hw=inv_hw),
            out_shape=out_shape,
            grid_spec=pltpu.PrefetchScalarGridSpec(
                num_scalar_prefetch=0,
                grid=grid,
                in_specs=[pl.BlockSpec((tile_rows, hw), lambda i: (i, 0))],
                out_specs=pl.BlockSpec((tile_rows, 1), lambda i: (i, 0)),
            ),
            compiler_params=pltpu.CompilerParams(
                dimension_semantics=("parallel",),
                vmem_limit_bytes=int(vmem_limit),
            ),
        )(x2)
    else:
        # ---- Path B: huge feature map -> tile H*W on a trailing reduction
        # axis and accumulate per-row partial sums in float32 VMEM scratch. ----
        tile_rows = rows if rows < sublane else sublane
        tile_hw = max(128, _round_down(budget // (tile_rows * acc_itemsize), 128))
        grid = (_cdiv(rows, tile_rows), _cdiv(hw, tile_hw))

        out2 = pl.pallas_call(
            functools.partial(_gap_split_kernel, inv_hw=inv_hw, hw=hw,
                              tile_hw=tile_hw),
            out_shape=out_shape,
            grid_spec=pltpu.PrefetchScalarGridSpec(
                num_scalar_prefetch=0,
                grid=grid,
                in_specs=[pl.BlockSpec((tile_rows, tile_hw),
                                       lambda i, j: (i, j))],
                out_specs=pl.BlockSpec((tile_rows, 1), lambda i, j: (i, 0)),
                scratch_shapes=[pltpu.VMEM((tile_rows, 1), jnp.float32)],
            ),
            compiler_params=pltpu.CompilerParams(
                dimension_semantics=("parallel", "arbitrary"),
                vmem_limit_bytes=int(vmem_limit),
            ),
        )(x2)

    return out2.reshape(N, C, 1, 1)


if __name__ == "__main__":
    key = jax.random.PRNGKey(0)
    key_a, key_b = jax.random.split(key)

    # Primary check: module-consistent small shape (path A, full-HW blocks).
    N, C, H, W = 2, 4, 16, 16
    x = jax.random.normal(key_a, (N, C, H, W), dtype=jnp.float32)
    out = jax.block_until_ready(global_avg_pool_2d(x))
    ref = jnp.mean(x, axis=(2, 3), keepdims=True)
    assert out.shape == (N, C, 1, 1), out.shape
    assert jnp.allclose(out, ref, atol=1e-5, rtol=1e-5), "path A mismatch"

    # Secondary check: force the split-HW accumulator path with a tiny VMEM
    # budget, plus ragged rows (N*C = 15) and ragged H*W (13*13 = 169).
    x_b = jax.random.normal(key_b, (3, 5, 13, 13), dtype=jnp.float32)
    out_b = jax.block_until_ready(
        global_avg_pool_2d(x_b, vmem_budget_bytes=4096))
    ref_b = jnp.mean(x_b, axis=(2, 3), keepdims=True)
    assert out_b.shape == (3, 5, 1, 1), out_b.shape
    assert jnp.allclose(out_b, ref_b, atol=1e-5, rtol=1e-5), "path B mismatch"

    print("KERNEL_OK")
</pallas_src>

<mosaic_0001>
module attributes {stable_mosaic.version = 11 : i64} {
  func.func @_gap_rows_kernel(%arg0: i32, %arg1: memref<8x256xf32, #tpu.memory_space<vmem>>, %arg2: memref<8x1xf32, #tpu.memory_space<vmem>>) attributes {dimension_semantics = [#tpu.dimension_semantics<parallel>], iteration_bounds = array<i64: 1>, scalar_prefetch = 0 : i64, scratch_operands = 0 : i64, tpu.core_type = #tpu.core_type<tc>, window_params = [{transform_indices = @transform_0, window_bounds = array<i64: 8, 256>}, {transform_indices = @transform_1, window_bounds = array<i64: 8, 1>}]} {
    %c0 = arith.constant 0 : index
    %c0_0 = arith.constant 0 : index
    %0 = vector.load %arg1[%c0, %c0_0] : memref<8x256xf32, #tpu.memory_space<vmem>>, vector<8x256xf32>
    %cst = arith.constant dense<0.000000e+00> : vector<8xf32>
    %1 = vector.multi_reduction <add>, %0, %cst [1] : vector<8x256xf32> to vector<8xf32>
    %2 = vector.shape_cast %1 : vector<8xf32> to vector<8x1xf32>
    %cst_1 = arith.constant 3.906250e-03 : f32
    %3 = vector.broadcast %cst_1 : f32 to vector<8x1xf32>
    %4 = arith.mulf %2, %3 : vector<8x1xf32>
    %c0_2 = arith.constant 0 : index
    %c0_3 = arith.constant 0 : index
    %5 = vector.load %arg2[%c0_2, %c0_3] : memref<8x1xf32, #tpu.memory_space<vmem>>, vector<8x1xf32>
    tpu.vector_store %arg2[%c0_2, %c0_3], %4 {strides = array<i32>} : memref<8x1xf32, #tpu.memory_space<vmem>>, vector<8x1xf32>,
    return
  }
  func.func @transform_0(%arg0: i32) -> (i32, i32) {
    %c0_i32 = arith.constant 0 : i32
    %c0_i32_0 = arith.constant 0 : i32
    return %arg0, %c0_i32 : i32, i32
  }
  func.func @transform_1(%arg0: i32) -> (i32, i32) {
    %c0_i32 = arith.constant 0 : i32
    %c0_i32_0 = arith.constant 0 : i32
    return %arg0, %c0_i32 : i32, i32
  }
}

</mosaic_0001>

<bundles_post_ra>
// kernel: tpu_custom_call.1
= control target key start
LH: loop header
LB: loop body
LE: loop exit
PB: predicated region body
PF: predicated region fallthrough
CT: control target
= control target key end

     0   :  { %6 = vsyncpa [#allocation3], 0  ;;  %s58_s6 = smov [#allocation2]   ;;  %s84_s0 = inlined_call_operand.hbm [shape: f32[8,256], index: 0, kind: input, shape index: {}]   ;;  %s85_s1 = inlined_call_operand.vmem [shape: f32[8,1], index: 1, kind: output, shape index: {}]  }
   0x1   :  { %s13_s7 = sshll.u32 %s58_s6, 4  ;;  %s34_s10 = scalar_lea.hbm %s84_s0, 256  ;;  %s14_s7 = int_to_ptr.vmem [resolvable:$true] %s13_s7 }
   0x2   :  { %p35_p0 = scmp.ne.s32.totalorder %s84_s0, %s34_s10  ;;  %p38_p1 = scmp.lt.u32.totalorder %s34_s10, %s84_s0 }
   0x4   :  { %p40_p2 = pnand %p38_p1, %p35_p0 }
   0x6   :  { %43 = shalt.err (!%p40_p2)
}
   0x7   :  { %s44_s15 = scalar_lea.vmem %s14_s7, 256  ;;  %p49_p4 = scmp.lt.s32.totalorder %s14_s7, %s14_s7 }
   0x8   :  { %p45_p3 = scmp.ne.s32.totalorder %s14_s7, %s44_s15  ;;  %p50_p5 = scmp.lt.s32.totalorder %s44_s15, %s44_s15 }
   0xa   :  { %p51_p6 = por %p50_p5, %p49_p4 }
   0xc   :  { %p52_p7 = pnand %p51_p6, %p45_p3 }
   0xe   :  { %55 = shalt.err (!%p52_p7)
}
   0xf   :  { %16 = dma.hbm_to_vmem [thread:$0]  %s84_s0, 256, %s14_s7, [#allocation3]  }
  0x10   :  { %56 = dma.done.wait [#allocation3], 256  }
  0x11   :  { %57 = vsyncadd [#allocation3], 4294967040  ;;  %v20_v0 = vld [vmem:[#allocation2] sm:$0xff]  ;;  %v21_v1 = vld [vmem:[#allocation2 + $0x8] sm:$0xff]  ;;  %vm26_vm0 = vcmask 7168  }
  0x12   :  { %v22_v2 = vadd.f32 %v21_v1, %v20_v0 }
  0x14   :  { %23 = vadd.xlane.f32.xlu0 %v22_v2 }
  0xa1   :  { %v24_v3 = vpop.xlane.xlu0 %23 }
  0xa2   :  { %v25_v4 = vmul.f32 0.00390625, %v24_v3 }
  0xa4   :  { %27 = vst.msk [vmem:[%s85_s1] sm:$0xff] %vm26_vm0, %v25_v4 }
  0xa5   :  { %32 = vsyncpa [#allocation3], 1 }

</bundles_post_ra>
